<compile_context>
chip_gen: v7x
topology: tpu7x:2x2x1
jax: 0.10.0
libtpu: 0.0.40
codegen_flags: <defaults>
</compile_context>

<pallas_src>
import jax
import jax.numpy as jnp
from jax.experimental import pallas as pl
from jax.experimental.pallas import tpu as pltpu


def _round_up(x: int, m: int) -> int:
    return ((x + m - 1) // m) * m


def _embed_kernel(labels_ref, table_ref, out_ref):
    # labels_ref: (R, G) int32  -- labels pre-offset by lane group: label + g*L
    #                              (invalid labels pre-masked to >= GL)
    # table_ref:  (GL, GD)      -- block-diagonal replicated table, lane-dense
    # out_ref:    (R, GD)       -- G gathered D-wide rows packed per output row
    R, G = labels_ref.shape
    GL = table_ref.shape[0]
    L = GL // G
    BAND = 128

    if GL % BAND == 0 and BAND % L == 0:
        # Band-wise one-hot: group g (rows [g*L, (g+1)*L) of the replicated
        # table) lies entirely inside band b = g // (BAND // L); only compare
        # it against that band's 128 lanes.  Bands are vreg-lane aligned, so
        # the concatenate below is pure lane placement (no VALU work).
        nb = GL // BAND
        gpb = BAND // L
        lane = jax.lax.broadcasted_iota(jnp.int32, (1, BAND), 1)
        parts = []
        for b in range(nb):                       # static unroll (nb small)
            hit = None
            for g in range(b * gpb, (b + 1) * gpb):
                cmp = lane == (labels_ref[:, g:g + 1] - b * BAND)
                hit = cmp if hit is None else (hit | cmp)
            parts.append(hit.astype(table_ref.dtype))
        one_hot = parts[0] if nb == 1 else jnp.concatenate(parts, axis=-1)
    else:
        # Generic fallback: compare every group against the full lane width.
        lane = jax.lax.broadcasted_iota(jnp.int32, (1, GL), 1)
        hit = lane == labels_ref[:, 0:1]
        for g in range(1, G):
            hit = hit | (lane == labels_ref[:, g:g + 1])
        one_hot = hit.astype(table_ref.dtype)

    # HIGHEST precision keeps the f32 table exact through the MXU (default
    # precision truncates to a single bf16 pass).  The extra MXU passes are
    # hidden: at these shapes the kernel is VPU / overhead bound, not MXU.
    out_ref[...] = jnp.dot(
        one_hot, table_ref[...],
        preferred_element_type=jnp.float32,
        precision=jax.lax.Precision.HIGHEST,
    ).astype(out_ref.dtype)


def make_sketch_learn_position_embedding(table, *, tile_rows=1024):
    """Factory: returns embed(position_labels) for a fixed embedding table.

    The per-weight prep (block-diagonal replication of the table, group
    offsets) is done once here, not on every call.
    """
    L, D = table.shape

    # Lane packing factor: pack G = 128 // D rows per 128-lane output row.
    G = (128 // D) if (D < 128 and 128 % D == 0) else 1
    GL, GD = G * L, G * D

    # Block-diagonal replicated table: kron(I_G, T)[g*L+l, g*D+d] = T[l, d].
    # Computed eagerly exactly once (static per weight).
    table_big = jnp.kron(jnp.eye(G, dtype=table.dtype), table) if G > 1 else table
    table_big = jax.block_until_ready(table_big)

    group_off = (jnp.arange(G, dtype=jnp.int32) * L)[None, :]   # (1, G)
    elt = jnp.dtype(table.dtype).itemsize
    row_align = 8 * G               # packed rows per tile must be multiple of 8

    @jax.jit
    def embed(position_labels):
        B, S = position_labels.shape
        N = B * S

        # Balanced tiling: choose the number of grid steps from tile_rows,
        # then size the tile to the work actually present (avoids ~2x padding
        # when N is just above a tile boundary).  Multiple steps also let
        # dimension_semantics=("parallel",) shard across v7x's two cores.
        nsteps = max(1, pl.cdiv(N, tile_rows))
        tr = _round_up(pl.cdiv(N, nsteps), row_align)   # flat rows per step
        N_pad = tr * nsteps
        R = tr // G                                      # packed rows per step

        # Labels: flatten, mask out-of-range/negative to the sentinel GL
        # (after the +g*L offset it stays >= GL, so it never matches a lane
        # -> zero output row and never aliases into another group's block),
        # pad, fold G labels per packed row, add per-column group offset g*L.
        lab = position_labels.reshape(-1).astype(jnp.int32)
        lab = jnp.where((lab >= 0) & (lab < L), lab, GL)
        lab = jnp.pad(lab, (0, N_pad - N), constant_values=GL)
        labels2d = lab.reshape(N_pad // G, G) + group_off

        # VMEM budget: table (2 pipeline buffers; the constant block index
        # means only one DMA actually happens) + label/output double buffers
        # + the (R, GL) one-hot / matmul staging.  Cap at 64 MiB (v7x).
        vmem_needed = (2 * GL * GD * elt
                       + 2 * R * G * 4
                       + 2 * R * GD * elt
                       + 2 * R * GL * 4)
        vmem_limit = int(min(64 * 2**20, max(2 * vmem_needed, 16 * 2**20)))

        cost = pl.CostEstimate(
            flops=int(2 * (N_pad // G) * GL * GD),
            transcendentals=0,
            bytes_accessed=int(N_pad * 4 + GL * GD * elt + N_pad * D * elt),
        )

        out_packed = pl.pallas_call(
            _embed_kernel,
            out_shape=jax.ShapeDtypeStruct((N_pad // G, GD), table.dtype),
            grid_spec=pltpu.PrefetchScalarGridSpec(
                num_scalar_prefetch=0,
                grid=(nsteps,),
                in_specs=[
                    # labels tile: (R, G); last dim equals the full array dim.
                    pl.BlockSpec((R, G), lambda i: (i, 0)),
                    # replicated table; constant block index -> fetched once.
                    pl.BlockSpec((GL, GD), lambda i: (0, 0)),
                ],
                # lane-dense output tile (GD == 128 when D < 128): unmasked vst.
                out_specs=pl.BlockSpec((R, GD), lambda i: (i, 0)),
            ),
            compiler_params=pltpu.CompilerParams(
                dimension_semantics=("parallel",),
                vmem_limit_bytes=vmem_limit,
            ),
            cost_estimate=cost,
        )(labels2d, table_big)

        out = out_packed.reshape(N_pad, D)[:N]   # free row-major reshape + crop
        return out.reshape(B, S, D)

    return embed


def sketch_learn_position_embedding(position_labels, table, *, tile_rows=1024):
    """One-shot convenience wrapper.  Prefer the factory in hot paths so the
    table replication is not rebuilt per call."""
    return make_sketch_learn_position_embedding(table, tile_rows=tile_rows)(
        position_labels)


if __name__ == "__main__":
    # Module hyper-params (small, consistent with the forward signature).
    max_length = 64
    pos_hidden_dim = 32
    batch, seq_len = 2, 8

    key = jax.random.PRNGKey(0)
    k_table, k_labels = jax.random.split(key)

    # nn.Embedding weight init ~ N(0, 1), deterministic here.
    table = jax.random.normal(k_table, (max_length, pos_hidden_dim),
                              dtype=jnp.float32)
    position_labels = jax.random.randint(
        k_labels, (batch, seq_len), minval=0, maxval=max_length, dtype=jnp.int32)

    embed = make_sketch_learn_position_embedding(table)
    out = jax.block_until_ready(embed(position_labels))

    # Reference check (plain JAX gather).
    ref = table[position_labels]
    assert out.shape == (batch, seq_len, pos_hidden_dim)
    assert jnp.allclose(out, ref, atol=1e-5), "mismatch vs reference embedding lookup"

    print("KERNEL_OK")
</pallas_src>

<mosaic_0001>
module attributes {stable_mosaic.version = 11 : i64} {
  func.func @_embed_kernel(%arg0: i32, %arg1: memref<8x4xi32, #tpu.memory_space<vmem>>, %arg2: memref<256x128xf32, #tpu.memory_space<vmem>>, %arg3: memref<8x128xf32, #tpu.memory_space<vmem>>) attributes {dimension_semantics = [#tpu.dimension_semantics<parallel>], iteration_bounds = array<i64: 1>, scalar_prefetch = 0 : i64, scratch_operands = 0 : i64, tpu.core_type = #tpu.core_type<tc>, window_params = [{transform_indices = @transform_0, window_bounds = array<i64: 8, 4>}, {pipeline_mode = #tpu.pipeline_mode<synchronous>, transform_indices = @transform_1, window_bounds = array<i64: 256, 128>}, {transform_indices = @transform_2, window_bounds = array<i64: 8, 128>}]} {
    %0 = tpu.iota {dimensions = array<i32: 1>} : vector<1x128xi32>
    %c0 = arith.constant 0 : index
    %c0_0 = arith.constant 0 : index
    %1 = vector.load %arg1[%c0, %c0_0] : memref<8x4xi32, #tpu.memory_space<vmem>>, vector<8x1xi32>
    %c0_i32 = arith.constant 0 : i32
    %2 = vector.broadcast %c0_i32 : i32 to vector<8x1xi32>
    %3 = arith.subi %1, %2 : vector<8x1xi32>
    %4 = vector.broadcast %0 : vector<1x128xi32> to vector<8x128xi32>
    %5 = vector.broadcast %3 : vector<8x1xi32> to vector<8x128xi32>
    %6 = arith.cmpi eq, %4, %5 : vector<8x128xi32>
    %c0_1 = arith.constant 0 : index
    %c1 = arith.constant 1 : index
    %7 = vector.load %arg1[%c0_1, %c1] : memref<8x4xi32, #tpu.memory_space<vmem>>, vector<8x1xi32>
    %c0_i32_2 = arith.constant 0 : i32
    %8 = vector.broadcast %c0_i32_2 : i32 to vector<8x1xi32>
    %9 = arith.subi %7, %8 : vector<8x1xi32>
    %10 = vector.broadcast %0 : vector<1x128xi32> to vector<8x128xi32>
    %11 = vector.broadcast %9 : vector<8x1xi32> to vector<8x128xi32>
    %12 = arith.cmpi eq, %10, %11 : vector<8x128xi32>
    %13 = arith.ori %6, %12 : vector<8x128xi1>
    %14 = arith.extui %13 : vector<8x128xi1> to vector<8x128xi32>
    %15 = arith.sitofp %14 : vector<8x128xi32> to vector<8x128xf32>
    %c0_3 = arith.constant 0 : index
    %c2 = arith.constant 2 : index
    %16 = vector.load %arg1[%c0_3, %c2] : memref<8x4xi32, #tpu.memory_space<vmem>>, vector<8x1xi32>
    %c128_i32 = arith.constant 128 : i32
    %17 = vector.broadcast %c128_i32 : i32 to vector<8x1xi32>
    %18 = arith.subi %16, %17 : vector<8x1xi32>
    %19 = vector.broadcast %0 : vector<1x128xi32> to vector<8x128xi32>
    %20 = vector.broadcast %18 : vector<8x1xi32> to vector<8x128xi32>
    %21 = arith.cmpi eq, %19, %20 : vector<8x128xi32>
    %c0_4 = arith.constant 0 : index
    %c3 = arith.constant 3 : index
    %22 = vector.load %arg1[%c0_4, %c3] : memref<8x4xi32, #tpu.memory_space<vmem>>, vector<8x1xi32>
    %c128_i32_5 = arith.constant 128 : i32
    %23 = vector.broadcast %c128_i32_5 : i32 to vector<8x1xi32>
    %24 = arith.subi %22, %23 : vector<8x1xi32>
    %25 = vector.broadcast %0 : vector<1x128xi32> to vector<8x128xi32>
    %26 = vector.broadcast %24 : vector<8x1xi32> to vector<8x128xi32>
    %27 = arith.cmpi eq, %25, %26 : vector<8x128xi32>
    %28 = arith.ori %21, %27 : vector<8x128xi1>
    %29 = arith.extui %28 : vector<8x128xi1> to vector<8x128xi32>
    %30 = arith.sitofp %29 : vector<8x128xi32> to vector<8x128xf32>
    %31 = tpu.concatenate %15, %30 in 1 : vector<8x128xf32>, vector<8x128xf32> -> vector<8x256xf32>
    %c0_6 = arith.constant 0 : index
    %c0_7 = arith.constant 0 : index
    %32 = vector.load %arg2[%c0_6, %c0_7] : memref<256x128xf32, #tpu.memory_space<vmem>>, vector<256x128xf32>
    %cst = arith.constant dense<0.000000e+00> : vector<8x128xf32>
    %33 = tpu.matmul %31, %32, %cst {dimension_numbers = #tpu.dot_dimension_numbers<[1], [0], [0], [1], [0, 0, 1, 1], [], []>, precision = #tpu.contract_precision<fp32>} : vector<8x256xf32>, vector<256x128xf32>, vector<8x128xf32> -> vector<8x128xf32>
    %c0_8 = arith.constant 0 : index
    %c0_9 = arith.constant 0 : index
    %34 = vector.load %arg3[%c0_8, %c0_9] : memref<8x128xf32, #tpu.memory_space<vmem>>, vector<8x128xf32>
    tpu.vector_store %arg3[%c0_8, %c0_9], %33 {strides = array<i32>} : memref<8x128xf32, #tpu.memory_space<vmem>>, vector<8x128xf32>,
    return
  }
  func.func @transform_0(%arg0: i32) -> (i32, i32) {
    %c0_i32 = arith.constant 0 : i32
    %c0_i32_0 = arith.constant 0 : i32
    return %arg0, %c0_i32 : i32, i32
  }
  func.func @transform_1(%arg0: i32) -> (i32, i32) {
    %c0_i32 = arith.constant 0 : i32
    %c0_i32_0 = arith.constant 0 : i32
    %c0_i32_1 = arith.constant 0 : i32
    return %c0_i32, %c0_i32_0 : i32, i32
  }
  func.func @transform_2(%arg0: i32) -> (i32, i32) {
    %c0_i32 = arith.constant 0 : i32
    %c0_i32_0 = arith.constant 0 : i32
    return %arg0, %c0_i32 : i32, i32
  }
}

</mosaic_0001>

<bundles_post_ra>
// kernel: embed.1
= control target key start
LH: loop header
LB: loop body
LE: loop exit
PB: predicated region body
PF: predicated region fallthrough
CT: control target
= control target key end

     0   :  { %7 = vsyncpa [#allocation3], 0  ;;  %s1399_s9 = smov [#allocation2]   ;;  %s2124_s0 = inlined_call_operand.vmem [shape: s32[8,4], index: 0, kind: input, shape index: {}]   ;;  %s2125_s1 = inlined_call_operand.hbm [shape: f32[256,128], index: 1, kind: input, shape index: {}]   ;;  %s2126_s2 = inlined_call_operand.vmem [shape: f32[8,128], index: 2, kind: output, shape index: {}]  }
   0x1   :  { %s15_s10 = sshll.u32 %s1399_s9, 4  ;;  %s1375_s13 = scalar_lea.hbm %s2125_s1, 4096  ;;  %s16_s10 = int_to_ptr.vmem [resolvable:$true] %s15_s10 }
   0x2   :  { %p1376_p0 = scmp.ne.s32.totalorder %s2125_s1, %s1375_s13  ;;  %p1379_p1 = scmp.lt.u32.totalorder %s1375_s13, %s2125_s1 }
   0x4   :  { %p1381_p2 = pnand %p1379_p1, %p1376_p0 }
   0x6   :  { %1384 = shalt.err (!%p1381_p2)
}
   0x7   :  { %s1385_s18 = scalar_lea.vmem %s16_s10, 4096  ;;  %p1390_p4 = scmp.lt.s32.totalorder %s16_s10, %s16_s10 }
   0x8   :  { %p1386_p3 = scmp.ne.s32.totalorder %s16_s10, %s1385_s18  ;;  %p1391_p5 = scmp.lt.s32.totalorder %s1385_s18, %s1385_s18 }
   0xa   :  { %p1392_p6 = por %p1391_p5, %p1390_p4 }
   0xc   :  { %p1393_p7 = pnand %p1392_p6, %p1386_p3 }
   0xe   :  { %1396 = shalt.err (!%p1393_p7)
}
   0xf   :  { %s1400_s19 = smov 128   ;;  %s1401_s20 = smov 8  }
  0x10   :  { %21 = dma.hbm_to_vmem [thread:$0]  %s2125_s1, 4096, %s16_s10, [#allocation3], %s1400_s19, %s1400_s19, %s1401_s20  }
  0x11   :  { %1397 = dma.done.wait [#allocation3], 4096  }
  0x12   :  { %1398 = vsyncadd [#allocation3], 4294963200  ;;  %v1402_v0 = vmov 0   ;;  %v1403_v1 = vmov 2   ;;  %v27_v2 = vld [vmem:[%s2124_s0] sm:$0xff]  ;;  %v1440_v4 = vld [vmem:[#allocation2 + $0x88] sm:$0xff] }
  0x13   :  { %1373 = vset.pattern.permute.xlu1 %v1402_v0  ;;  %1371 = vset.pattern.permute.xlu0 %v1403_v1  ;;  %v1438_v3 = vld [vmem:[#allocation2 + $0x80] sm:$0xff]  ;;  %v952_v5 = vadd.s32 4294967168, %v27_v2  ;;  %v135_v7 = vand.u32 4294901760, %v1440_v4  ;;  %v1446_v9 = vld [vmem:[#allocation2 + $0x8] sm:$0xff]  ;;  %v1448_v10 = vld [vmem:[#allocation2 + $0x90] sm:$0xff]  ;;  %v1404_v25 = vmov 1  }
  0x14   :  { %29 = vperm.xlu1 %1373, %v27_v2   ;;  %v132_v6 = vand.u32 4294901760, %v1438_v3  ;;  %v1444_v8 = vld [vmem:[#allocation2] sm:$0xff]  ;;  %v87_v12 = vand.u32 4294901760, %v1446_v9  ;;  %v1452_v13 = vld [vmem:[#allocation2 + $0x98] sm:$0xff]  ;;  %v138_v14 = vand.u32 4294901760, %v1448_v10  ;;  %v1455_v15 = vld [vmem:[#allocation2 + $0x10] sm:$0xff] }
  0x15   :  { %v84_v11 = vand.u32 4294901760, %v1444_v8  ;;  %v1457_v16 = vld [vmem:[#allocation2 + $0x18] sm:$0xff]  ;;  %41 = vperm.xlu0 %1371, %v952_v5   ;;  %v1463_v18 = vsub.f32 %v1440_v4, %v135_v7  ;;  %v141_v19 = vand.u32 4294901760, %v1452_v13  ;;  %v90_v20 = vand.u32 4294901760, %v1455_v15  ;;  %v1521_v43 = vld [vmem:[#allocation2 + $0xa0] sm:$0xff]  ;;  %v1529_v48 = vld [vmem:[#allocation2 + $0xa8] sm:$0xff] }
  0x16   :  { %v1460_v17 = vsub.f32 %v1438_v3, %v132_v6  ;;  %v1475_v22 = vsub.f32 %v1446_v9, %v87_v12  ;;  %v1480_v23 = vsub.f32 %v1448_v10, %v138_v14  ;;  %v93_v24 = vand.u32 4294901760, %v1457_v16  ;;  %v1534_v53 = vld [vmem:[#allocation2 + $0x20] sm:$0xff]  ;;  %v1536_v54 = vld [vmem:[#allocation2 + $0x28] sm:$0xff]  ;;  %v1539_v59 = vld [vmem:[#allocation2 + $0xb0] sm:$0xff] }
  0x17   :  { %v1470_v21 = vsub.f32 %v1444_v8, %v84_v11  ;;  %v2145_v27 = vand.u32 4294901760, %v1463_v18  ;;  %v1488_v28 = vsub.f32 %v1452_v13, %v141_v19  ;;  %v1493_v29 = vsub.f32 %v1455_v15, %v90_v20  ;;  %v1544_v0 = vld [vmem:[#allocation2 + $0xb8] sm:$0xff] }
  0x18   :  { %1374 = vset.pattern.permute.xlu1 %v1404_v25  ;;  %v2147_v26 = vand.u32 4294901760, %v1460_v17  ;;  %v2141_v31 = vand.u32 4294901760, %v1475_v22  ;;  %v2140_v32 = vand.u32 4294901760, %v1480_v23  ;;  %v1501_v33 = vsub.f32 %v1457_v16, %v93_v24  ;;  %v1580_v9 = vld [vmem:[#allocation2 + $0x38] sm:$0xff] }
  0x19   :  { %33 = vperm.xlu1 %1374, %v27_v2   ;;  %v2143_v30 = vand.u32 4294901760, %v1470_v21  ;;  %v1405_v34 = vmov 3   ;;  %v318_v36 = vsub.f32 %v1463_v18, %v2145_v27  ;;  %v2139_v37 = vand.u32 4294901760, %v1488_v28 }
  0x1a   :  { %1372 = vset.pattern.permute.xlu0 %v1405_v34  ;;  %v311_v35 = vsub.f32 %v1460_v17, %v2147_v26  ;;  %v2136_v38 = vand.u32 4294901760, %v1493_v29  ;;  %v206_v40 = vsub.f32 %v1475_v22, %v2141_v31  ;;  %v325_v41 = vsub.f32 %v1480_v23, %v2140_v32  ;;  %v1743_v32 = vld [vmem:[#allocation2 + $0xe0] sm:$0xff] }
  0x1b   :  { %45 = vperm.xlu0 %1372, %v952_v5   ;;  %v199_v39 = vsub.f32 %v1470_v21, %v2143_v30  ;;  %v2132_v42 = vand.u32 4294901760, %v1501_v33  ;;  %v319_v45 = vand.u32 4294901760, %v318_v36  ;;  %v332_v46 = vsub.f32 %v1488_v28, %v2139_v37  ;;  %v1553_v5 = vld [vmem:[#allocation2 + $0x30] sm:$0xff]  ;;  %v1769_v26 = vld [vmem:[#allocation2 + $0x60] sm:$0xff] }
  0x1c   :  { %v312_v44 = vand.u32 4294901760, %v311_v35  ;;  %v213_v47 = vsub.f32 %v1493_v29, %v2136_v38  ;;  %v207_v50 = vand.u32 4294901760, %v206_v40  ;;  %v326_v51 = vand.u32 4294901760, %v325_v41 }
  0x1d   :  { %v200_v49 = vand.u32 4294901760, %v199_v39  ;;  %v220_v52 = vsub.f32 %v1501_v33, %v2132_v42  ;;  %v333_v56 = vand.u32 4294901760, %v332_v46  ;;  %v144_v58 = vand.u32 4294901760, %v1521_v43 }
  0x1e   :  { %v1202_v55 = vpack.c.bf16 %v319_v45, %v312_v44  ;;  %v214_v57 = vand.u32 4294901760, %v213_v47  ;;  %v147_v62 = vand.u32 4294901760, %v1529_v48  ;;  %v1542_v63 = vpack.c.bf16 %v135_v7, %v132_v6 }
  0x1f   :  { %v1204_v60 = vpack.c.bf16 %v207_v50, %v200_v49  ;;  %v221_v61 = vand.u32 4294901760, %v220_v52  ;;  %v1206_v1 = vpack.c.bf16 %v333_v56, %v326_v51  ;;  %v1549_v2 = vsub.f32 %v1521_v43, %v144_v58 }
  0x20   :  { %1203 = vmatprep.subr.bf16.mxu1 %v1202_v55  ;;  %v96_v3 = vand.u32 4294901760, %v1534_v53  ;;  %v99_v4 = vand.u32 4294901760, %v1536_v54  ;;  %v1558_v6 = vsub.f32 %v1529_v48, %v147_v62  ;;  %1171 = vmatprep.subr.bf16.mxu0 %v1542_v63  ;;  %v1565_v7 = vpack.c.bf16 %v87_v12, %v84_v11 }
  0x21   :  { %1205 = vmatpush3.bf16.msra.mxu1 %v1204_v60  ;;  %v1208_v25 = vpack.c.bf16 %v221_v61, %v214_v57  ;;  %v150_v34 = vand.u32 4294901760, %v1539_v59  ;;  %v2131_v35 = vand.u32 4294901760, %v1549_v2  ;;  %v153_v8 = vand.u32 4294901760, %v1544_v0  ;;  %v1633_v61 = vld [vmem:[#allocation2 + $0xc0] sm:$0xff] }
  0x22   :  { %1207 = vmatprep.subr.bf16.mxu1 %v1206_v1  ;;  %v1572_v36 = vsub.f32 %v1534_v53, %v96_v3  ;;  %v1577_v39 = vsub.f32 %v1536_v54, %v99_v4  ;;  %v2130_v11 = vand.u32 4294901760, %v1558_v6  ;;  %1173 = vmatpush3.bf16.msra.mxu0 %v1565_v7  ;;  %v1593_v40 = vpack.c.bf16 %v141_v19, %v138_v14  ;;  %v1635_v1 = vld [vmem:[#allocation2 + $0xc8] sm:$0xff]  ;;  %v1705_v53 = vld [vmem:[#allocation2 + $0x58] sm:$0xff] }
  0x23   :  { %v1587_v12 = vsub.f32 %v1539_v59, %v150_v34  ;;  %v102_v41 = vand.u32 4294901760, %v1553_v5  ;;  %v339_v44 = vsub.f32 %v1549_v2, %v2131_v35  ;;  %v1604_v47 = vsub.f32 %v1544_v0, %v153_v8 }
  0x24   :  { %v2129_v45 = vand.u32 4294901760, %v1572_v36  ;;  %v2128_v46 = vand.u32 4294901760, %v1577_v39  ;;  %v346_v10 = vsub.f32 %v1558_v6, %v2130_v11  ;;  %1175 = vmatprep.subr.bf16.mxu0 %v1593_v40  ;;  %v105_v14 = vand.u32 4294901760, %v1580_v9 }
  0x25   :  { %1209 = vmatpush3.bf16.msra.mxu1 %v1208_v25  ;;  %v2127_v13 = vand.u32 4294901760, %v1587_v12  ;;  %v1615_v19 = vsub.f32 %v1553_v5, %v102_v41  ;;  %v340_v49 = vand.u32 4294901760, %v339_v44  ;;  %v2133_v52 = vand.u32 4294901760, %v1604_v47 }
  0x26   :  { %v227_v50 = vsub.f32 %v1572_v36, %v2129_v45  ;;  %v234_v51 = vsub.f32 %v1577_v39, %v2128_v46  ;;  %v347_v55 = vand.u32 4294901760, %v346_v10  ;;  %v1631_v60 = vsub.f32 %v1580_v9, %v105_v14  ;;  %v1646_v46 = vld [vmem:[#allocation2 + $0x40] sm:$0xff] }
  0x27   :  { %v353_v56 = vsub.f32 %v1587_v12, %v2127_v13  ;;  %v2135_v57 = vand.u32 4294901760, %v1615_v19  ;;  %v360_v10 = vsub.f32 %v1604_v47, %v2133_v52  ;;  %v1644_v13 = vpack.c.bf16 %v93_v24, %v90_v20  ;;  %v1657_v20 = vld [vmem:[#allocation2 + $0xd0] sm:$0xff] }
  0x28   :  { %v228_v25 = vand.u32 4294901760, %v227_v50  ;;  %v235_v44 = vand.u32 4294901760, %v234_v51  ;;  %v1210_v45 = vpack.c.bf16 %v347_v55, %v340_v49  ;;  %v2134_v50 = vand.u32 4294901760, %v1631_v60  ;;  %v1652_v51 = vld [vmem:[#allocation2 + $0x48] sm:$0xff] }
  0x29   :  { %v354_v11 = vand.u32 4294901760, %v353_v56  ;;  %v241_v35 = vsub.f32 %v1615_v19, %v2135_v57  ;;  %v361_v52 = vand.u32 4294901760, %v360_v10  ;;  %1177 = vmatpush3.bf16.msra.mxu0 %v1644_v13  ;;  %v156_v15 = vand.u32 4294901760, %v1633_v61 }
  0x2a   :  { %v1212_v42 = vpack.c.bf16 %v235_v44, %v228_v25  ;;  %v159_v16 = vand.u32 4294901760, %v1635_v1  ;;  %1211 = vmatprep.subr.bf16.mxu1 %v1210_v45  ;;  %v248_v49 = vsub.f32 %v1631_v60, %v2134_v50  ;;  %v1666_v55 = vpack.c.bf16 %v147_v62, %v144_v58  ;;  %v1669_v25 = vld [vmem:[#allocation2 + $0xd8] sm:$0xff]  ;;  %v1703_v50 = vld [vmem:[#allocation2 + $0x50] sm:$0xff] }
  0x2b   :  { %v242_v24 = vand.u32 4294901760, %v241_v35  ;;  %v108_v56 = vand.u32 4294901760, %v1646_v46  ;;  %v1214_v44 = vpack.c.bf16 %v361_v52, %v354_v11  ;;  %v1674_v35 = vsub.f32 %v1633_v61, %v156_v15 }
  0x2c   :  { %1213 = vmatpush3.bf16.msra.mxu1 %v1212_v42  ;;  %v1679_v45 = vsub.f32 %v1635_v1, %v159_v16  ;;  %v111_v43 = vand.u32 4294901760, %v1652_v51  ;;  %v249_v48 = vand.u32 4294901760, %v248_v49  ;;  %1179 = vmatprep.subr.bf16.mxu0 %v1666_v55  ;;  %v1692_v58 = vpack.c.bf16 %v99_v4, %v96_v3 }
  0x2d   :  { %v1686_v42 = vsub.f32 %v1646_v46, %v108_v56  ;;  %v162_v62 = vand.u32 4294901760, %v1657_v20  ;;  %1215 = vmatprep.subr.bf16.mxu1 %v1214_v44  ;;  %v2138_v11 = vand.u32 4294901760, %v1674_v35  ;;  %v2150_v49 = vand.u32 4294901760, %v1669_v25 }
  0x2e   :  { %v2137_v52 = vand.u32 4294901760, %v1679_v45  ;;  %v1700_v10 = vsub.f32 %v1652_v51, %v111_v43  ;;  %v1216_v54 = vpack.c.bf16 %v249_v48, %v242_v24  ;;  %1181 = vmatpush3.bf16.msra.mxu0 %v1692_v58  ;;  %v1718_v44 = vpack.c.bf16 %v153_v8, %v150_v34  ;;  %v65_v51 = vld [vmem:[#allocation2 + $0x70] sm:$0xff] }
  0x2f   :  { %v2142_v3 = vand.u32 4294901760, %v1686_v42  ;;  %v1712_v4 = vsub.f32 %v1657_v20, %v162_v62  ;;  %v367_v57 = vsub.f32 %v1674_v35, %v2138_v11  ;;  %v1730_v38 = vsub.f32 %v1669_v25, %v2150_v49 }
  0x30   :  { %2170 = vst [vmem:[#allocation5_spill] sm:$0xff] %v1718_v44  ;;  %v374_v24 = vsub.f32 %v1679_v45, %v2137_v52  ;;  %v2144_v48 = vand.u32 4294901760, %v1700_v10  ;;  %1217 = vmatpush3.bf16.msra.mxu1 %v1216_v54  ;;  %1183 = vmatprep.subr.bf16.mxu0 %v1718_v44  ;;  %v2148_v34 = vand.u32 4294901760, %v1703_v50  ;;  %v2149_v8 = vand.u32 4294901760, %v1705_v53 }
  0x31   :  { %v255_v59 = vsub.f32 %v1686_v42, %v2142_v3  ;;  %v2146_v0 = vand.u32 4294901760, %v1712_v4  ;;  %v368_v52 = vand.u32 4294901760, %v367_v57  ;;  %v2151_v54 = vand.u32 4294901760, %v1730_v38 }
  0x32   :  { %v375_v11 = vand.u32 4294901760, %v374_v24  ;;  %v262_v37 = vsub.f32 %v1700_v10, %v2144_v48  ;;  %v1751_v30 = vsub.f32 %v1703_v50, %v2148_v34  ;;  %v1756_v57 = vsub.f32 %v1705_v53, %v2149_v8  ;;  %v1758_v24 = vld [vmem:[#allocation2 + $0xe8] sm:$0xff] }
  0x33   :  { %v256_v31 = vand.u32 4294901760, %v255_v59  ;;  %v381_v3 = vsub.f32 %v1712_v4, %v2146_v0  ;;  %v388_v59 = vsub.f32 %v1730_v38, %v2151_v54  ;;  %v1767_v0 = vpack.c.bf16 %v105_v14, %v102_v41 }
  0x34   :  { %v1218_v48 = vpack.c.bf16 %v375_v11, %v368_v52  ;;  %v263_v27 = vand.u32 4294901760, %v262_v37  ;;  %v2154_v8 = vand.u32 4294901760, %v1751_v30  ;;  %v2152_v49 = vand.u32 4294901760, %v1756_v57  ;;  %v1774_v37 = vld [vmem:[#allocation2 + $0x68] sm:$0xff] }
  0x35   :  { %2171 = vst [vmem:[#allocation6_spill] sm:$0xff] %v1767_v0  ;;  %v382_v34 = vand.u32 4294901760, %v381_v3  ;;  %v168_v11 = vand.u32 4294901760, %v1743_v32  ;;  %v389_v54 = vand.u32 4294901760, %v388_v59  ;;  %1185 = vmatpush3.bf16.msra.mxu0 %v1767_v0  ;;  %v171_v5 = vand.u32 4294901760, %v1758_v24  ;;  %v81_v3 = vld [vmem:[#allocation2 + $0xf0] sm:$0xff] }
  0x36   :  { %1219 = vmatprep.subr.bf16.mxu1 %v1218_v48  ;;  %v1220_v52 = vpack.c.bf16 %v263_v27, %v256_v31  ;;  %v1782_v9 = vpack.c.bf16 %v159_v16, %v156_v15  ;;  %v269_v41 = vsub.f32 %v1751_v30, %v2154_v8  ;;  %v276_v14 = vsub.f32 %v1756_v57, %v2152_v49 }
  0x37   :  { %v1791_v27 = vsub.f32 %v1743_v32, %v168_v11  ;;  %v120_v31 = vand.u32 4294901760, %v1769_v26  ;;  %v1222_v61 = vpack.c.bf16 %v389_v54, %v382_v34  ;;  %v1795_v1 = vsub.f32 %v1758_v24, %v171_v5  ;;  %v82_v32 = vld [vmem:[#allocation2 + $0xf8] sm:$0xff] }
  0x38   :  { %2172 = vst [vmem:[#allocation7_spill] sm:$0xff] %v1782_v9  ;;  %1221 = vmatpush3.bf16.msra.mxu1 %v1220_v52  ;;  %1187 = vmatprep.subr.bf16.mxu0 %v1782_v9  ;;  %v123_v15 = vand.u32 4294901760, %v1774_v37  ;;  %v1803_v16 = vpack.c.bf16 %v111_v43, %v108_v56  ;;  %v270_v48 = vand.u32 4294901760, %v269_v41  ;;  %v277_v59 = vand.u32 4294901760, %v276_v14 }
  0x39   :  { %v2153_v49 = vand.u32 4294901760, %v1791_v27  ;;  %v1807_v34 = vsub.f32 %v1769_v26, %v120_v31  ;;  %1223 = vmatprep.subr.bf16.mxu1 %v1222_v61  ;;  %v2159_v54 = vand.u32 4294901760, %v1795_v1  ;;  %v174_v46 = vand.u32 4294901760, %v81_v3  ;;  %v66_v26 = vld [vmem:[#allocation2 + $0x78] sm:$0xff] }
  0x3a   :  { %2173 = vst [vmem:[#allocation8_spill] sm:$0xff] %v1803_v16  ;;  %v1811_v24 = vsub.f32 %v1774_v37, %v123_v15  ;;  %1189 = vmatpush3.bf16.msra.mxu0 %v1803_v16  ;;  %v1224_v56 = vpack.c.bf16 %v277_v59, %v270_v48  ;;  %v177_v41 = vand.u32 4294901760, %v82_v32  ;;  %v2174_v48 = vand.u32 4294901760, %v1669_v25 }
  0x3b   :  { %v395_v43 = vsub.f32 %v1791_v27, %v2153_v49  ;;  %v2160_v52 = vand.u32 4294901760, %v1807_v34  ;;  %v402_v14 = vsub.f32 %v1795_v1, %v2159_v54  ;;  %v1822_v61 = vsub.f32 %v81_v3, %v174_v46 }
  0x3c   :  { %v2163_v37 = vand.u32 4294901760, %v1811_v24  ;;  %v1828_v59 = vpack.c.bf16 %v2174_v48, %v162_v62  ;;  %1225 = vmatpush3.bf16.msra.mxu1 %v1224_v56  ;;  %v1833_v16 = vsub.f32 %v82_v32, %v177_v41  ;;  %v126_v9 = vand.u32 4294901760, %v65_v51 }
  0x3d   :  { %v396_v49 = vand.u32 4294901760, %v395_v43  ;;  %v283_v8 = vsub.f32 %v1807_v34, %v2160_v52  ;;  %v403_v54 = vand.u32 4294901760, %v402_v14  ;;  %v2167_v20 = vand.u32 4294901760, %v1822_v61 }
  0x3e   :  { %v290_v3 = vsub.f32 %v1811_v24, %v2163_v37  ;;  %1191 = vmatprep.subr.bf16.mxu0 %v1828_v59  ;;  %v129_v25 = vand.u32 4294901760, %v66_v26  ;;  %v2166_v56 = vand.u32 4294901760, %v1833_v16  ;;  %v1841_v43 = vsub.f32 %v65_v51, %v126_v9 }
  0x3f   :  { %v284_v62 = vand.u32 4294901760, %v283_v8  ;;  %v2175_v48 = vand.u32 4294901760, %v1703_v50  ;;  %v2176_v32 = vand.u32 4294901760, %v1705_v53  ;;  %v1226_v14 = vpack.c.bf16 %v403_v54, %v396_v49 }
  0x40   :  { %v291_v0 = vand.u32 4294901760, %v290_v3  ;;  %v409_v37 = vsub.f32 %v1822_v61, %v2167_v20  ;;  %v1852_v44 = vsub.f32 %v66_v26, %v129_v25  ;;  %v416_v8 = vsub.f32 %v1833_v16, %v2166_v56 }
  0x41   :  { %v1847_v52 = vpack.c.bf16 %v2176_v32, %v2175_v48  ;;  %v296_v51 = vand.u32 4294901760, %v1841_v43  ;;  %v1859_v50 = vpack.c.bf16 %v171_v5, %v168_v11  ;;  %1227 = vmatprep.subr.bf16.mxu1 %v1226_v14  ;;  %v1862_v3 = vpack.c.bf16 %v123_v15, %v120_v31 }
  0x42   :  { %v1228_v53 = vpack.c.bf16 %v291_v0, %v284_v62  ;;  %v410_v49 = vand.u32 4294901760, %v409_v37  ;;  %v303_v54 = vand.u32 4294901760, %v1852_v44  ;;  %v417_v48 = vand.u32 4294901760, %v416_v8 }
  0x43   :  { %1193 = vmatpush3.bf16.msra.mxu0 %v1847_v52  ;;  %v297_v26 = vsub.f32 %v1841_v43, %v296_v51  ;;  %v1866_v32 = vpack.c.bf16 %v177_v41, %v174_v46  ;;  %v1868_v56 = vpack.c.bf16 %v129_v25, %v126_v9  ;;  %v1234_v0 = vpack.c.bf16 %v1463_v18, %v1460_v17 }
  0x44   :  { %1195 = vmatprep.subr.bf16.mxu0 %v1859_v50  ;;  %1229 = vmatpush3.bf16.msra.mxu1 %v1228_v53  ;;  %v304_v11 = vsub.f32 %v1852_v44, %v303_v54  ;;  %v1230_v15 = vpack.c.bf16 %v417_v48, %v410_v49  ;;  %v2177_v49 = vand.u32 4294901760, %v1460_v17  ;;  %v2178_v8 = vand.u32 4294901760, %v1463_v18 }
  0x45   :  { %v298_v37 = vand.u32 4294901760, %v297_v26  ;;  %v2181_v14 = vand.u32 4294901760, %v1480_v23  ;;  %v2183_v17 = vand.u32 4294901760, %v1493_v29  ;;  %v2184_v18 = vand.u32 4294901760, %v1501_v33 }
  0x46   :  { %v305_v41 = vand.u32 4294901760, %v304_v11  ;;  %1231 = vmatprep.subr.bf16.mxu1 %v1230_v15  ;;  %v1910_v48 = vpack.c.bf16 %v2178_v8, %v2177_v49  ;;  %v2182_v15 = vand.u32 4294901760, %v1488_v28  ;;  %v2185_v49 = vand.u32 4294901760, %v1549_v2 }
  0x47   :  { %1197 = vmatpush3.bf16.msra.mxu0 %v1862_v3  ;;  %v1928_v8 = vpack.c.bf16 %v2184_v18, %v2183_v17  ;;  %v2187_v53 = vand.u32 4294901760, %v1572_v36  ;;  %v2192_v18 = vand.u32 4294901760, %v1615_v19  ;;  %v2193_v25 = vand.u32 4294901760, %v1631_v60 }
  0x48   :  { %1199 = vmatprep.subr.bf16.mxu0 %v1866_v32  ;;  %v1232_v26 = vpack.c.bf16 %v305_v41, %v298_v37  ;;  %v2179_v37 = vand.u32 4294901760, %v1470_v21  ;;  %v2180_v41 = vand.u32 4294901760, %v1475_v22  ;;  %v1922_v62 = vpack.c.bf16 %v2182_v15, %v2181_v14 }
  0x49   :  { %v2188_v14 = vand.u32 4294901760, %v1577_v39  ;;  %v2190_v15 = vand.u32 4294901760, %v1604_v47  ;;  %v1953_v46 = vpack.c.bf16 %v2193_v25, %v2192_v18  ;;  %v2204_v25 = vand.u32 4294901760, %v1751_v30 }
  0x4a   :  { %v1916_v11 = vpack.c.bf16 %v2180_v41, %v2179_v37  ;;  %1233 = vmatpush3.bf16.msra.mxu1 %v1232_v26  ;;  %v2186_v37 = vand.u32 4294901760, %v1558_v6  ;;  %v2205_v18 = vand.u32 4294901760, %v1756_v57 }
  0x4b   :  { %1201 = vmatpush3.bf16.msra.mxu0 %v1868_v56  ;;  %1267 = vmatprep.subr.bf16.mxu1 %v1542_v63  ;;  %v1941_v26 = vpack.c.bf16 %v2188_v14, %v2187_v53  ;;  %2194 = vst [vmem:[#allocation10_spill] sm:$0xff] %v1953_v46  ;;  %v2198_v53 = vand.u32 4294901760, %v1686_v42  ;;  %v2199_v14 = vand.u32 4294901760, %v1700_v10 }
  0x4c   :  { %1235 = vmatprep.subr.bf16.mxu0 %v1234_v0  ;;  %v1935_v41 = vpack.c.bf16 %v2186_v37, %v2185_v49  ;;  %v2189_v0 = vand.u32 4294901760, %v1587_v12  ;;  %v2195_v49 = vand.u32 4294901760, %v1674_v35  ;;  %v2196_v37 = vand.u32 4294901760, %v1679_v45 }
  0x4d   :  { %v1965_v31 = vpack.c.bf16 %v2199_v14, %v2198_v53  ;;  %v1977_v20 = vpack.c.bf16 %v2205_v18, %v2204_v25  ;;  %v2209_v53 = vand.u32 4294901760, %v1807_v34  ;;  %v2210_v14 = vand.u32 4294901760, %v1811_v24 }
  0x4e   :  { %v1947_v17 = vpack.c.bf16 %v2190_v15, %v2189_v0  ;;  %v1959_v9 = vpack.c.bf16 %v2196_v37, %v2195_v49  ;;  %v2201_v0 = vand.u32 4294901760, %v1712_v4  ;;  %v2202_v15 = vand.u32 4294901760, %v1730_v38 }
  0x4f   :  { %2200 = vst [vmem:[#allocation12_spill] sm:$0xff] %v1965_v31  ;;  %2206 = vst [vmem:[#allocation14_spill] sm:$0xff] %v1977_v20  ;;  %v2207_v49 = vand.u32 4294901760, %v1791_v27  ;;  %v2208_v37 = vand.u32 4294901760, %v1795_v1  ;;  %v1989_v31 = vpack.c.bf16 %v2210_v14, %v2209_v53  ;;  %v1997_v25 = vpack.c.bf16 %v303_v54, %v296_v51 }
  0x50   :  { %2191 = vst [vmem:[#allocation9_spill] sm:$0xff] %v1947_v17  ;;  %2197 = vst [vmem:[#allocation11_spill] sm:$0xff] %v1959_v9  ;;  %v1971_v5 = vpack.c.bf16 %v2202_v15, %v2201_v0  ;;  %v2211_v0 = vand.u32 4294901760, %v1822_v61  ;;  %v2212_v15 = vand.u32 4294901760, %v1833_v16  ;;  %v25_v18 = vlaneseq }
  0x51   :  { %v1983_v9 = vpack.c.bf16 %v2208_v37, %v2207_v49  ;;  %2213 = vst [vmem:[#allocation15_spill] sm:$0xff] %v1997_v25  ;;  %v1406_v14 = vmov 0.0   ;;  %v2221_v25 = vld [vmem:[#allocation6_spill] sm:$0xff] }
  0x52   :  { %2203 = vst [vmem:[#allocation13_spill] sm:$0xff] %v1971_v5  ;;  %v1995_v5 = vpack.c.bf16 %v2212_v15, %v2211_v0  ;;  %v26_v46 = vand.u32 127, %v25_v18  ;;  %v2168_v15 = vmov 1.0  }
  0x93   :  { %v30_v20 = vpop.permute.xlu1 %29 }
  0x94   :  { %v42_v17 = vpop.permute.xlu0 %41  ;;  %vm31_vm0 = vcmp.eq.s32.totalorder %v26_v46, %v30_v20 }
  0x95   :  { %vm43_vm3 = vcmp.eq.s32.totalorder %v26_v46, %v42_v17 }
  0x98   :  { %v34_v49 = vpop.permute.xlu1 %33 }
  0x99   :  { %vm35_vm1 = vcmp.eq.s32.totalorder %v26_v46, %v34_v49 }
  0x9a   :  { %vm1999_vm2 = vmor %vm31_vm0, %vm35_vm1  ;;  %v46_v53 = vpop.permute.xlu0 %45 }
  0x9b   :  { %v951_v0 = vsel %vm1999_vm2, 1.0, %v1406_v14  ;;  %vm47_vm4 = vcmp.eq.s32.totalorder %v26_v46, %v46_v53 }
  0x9c   :  { %v186_v51 = vsub.f32 %v951_v0, %v951_v0  ;;  %vm2005_vm5 = vmor %vm43_vm3, %vm47_vm4 }
  0x9d   :  { %v953_v20 = vsel %vm2005_vm5, 1.0, %v1406_v14  ;;  %954 = vmatprep.mubr.msk.f32.mxu1 %vm2005_vm5, %v2168_v15 }
  0x9e   :  { %v180_v18 = vsub.f32 %v953_v20, %v953_v20  ;;  %955 = vmatmul.mubr.msk.f32.vlgmr.msra.gmra.mrb[0].mxu1 %vm1999_vm2, %v2168_v15  ;;  %v187_v17 = vand.u32 4294901760, %v186_v51  ;;  %v2218_v20 = vpack.c.bf16 %v1475_v22, %v1470_v21  ;;  %v2219_v15 = vld [vmem:[#allocation5_spill] sm:$0xff]  ;;  %v2225_v21 = vld [vmem:[#allocation8_spill] sm:$0xff]  ;;  %v2226_v22 = vpack.c.bf16 %v1577_v39, %v1572_v36 }
  0x9f   :  { %1269 = vmatpush3.bf16.msra.mxu1 %v1565_v7  ;;  %v2233_v36 = vpack.c.bf16 %v1795_v1, %v1791_v27  ;;  %v2234_v39 = vmov 1.0  }
  0xa0   :  { %1271 = vmatprep.subr.bf16.mxu1 %v1593_v40  ;;  %v181_v46 = vand.u32 4294901760, %v180_v18  ;;  %v188_v49 = vsub.f32 %v186_v51, %v187_v17 }
  0xa2   :  { %664 = vmatprep.mubr.f32.mxu1 %v181_v46  ;;  %v182_v53 = vsub.f32 %v180_v18, %v181_v46  ;;  %v189_v0 = vand.u32 4294901760, %v188_v49  ;;  %v2220_v46 = vpack.c.bf16 %v1488_v28, %v1480_v23  ;;  %v2222_v49 = vpack.c.bf16 %v1501_v33, %v1493_v29 }
  0xa3   :  { %1273 = vmatpush3.bf16.msra.mxu1 %v1644_v13  ;;  %v2227_v23 = vpack.c.bf16 %v1604_v47, %v1587_v12  ;;  %v2228_v28 = vpack.c.bf16 %v1631_v60, %v1615_v19  ;;  %v2229_v29 = vpack.c.bf16 %v1679_v45, %v1674_v35  ;;  %v2230_v33 = vpack.c.bf16 %v1700_v10, %v1686_v42  ;;  %v2239_v12 = vld [vmem:[#allocation10_spill] sm:$0xff]  ;;  %v2241_v47 = vld [vmem:[#allocation12_spill] sm:$0xff]  ;;  %v2244_v60 = vld [vmem:[#allocation15_spill] sm:$0xff] }
  0xa4   :  { %1275 = vmatprep.subr.bf16.mxu1 %v1666_v55  ;;  %v183_v14 = vand.u32 4294901760, %v182_v53  ;;  %v2223_v53 = vld [vmem:[#allocation7_spill] sm:$0xff]  ;;  %v2243_v19 = vld [vmem:[#allocation14_spill] sm:$0xff] }
  0xa6   :  { %184 = vmatprep.mubr.f32.mxu0 %v183_v14  ;;  %v2224_v14 = vpack.c.bf16 %v1558_v6, %v1549_v2  ;;  %v2231_v2 = vpack.c.bf16 %v1730_v38, %v1712_v4  ;;  %v2232_v6 = vpack.c.bf16 %v1756_v57, %v1751_v30  ;;  %v2235_v38 = vpack.c.bf16 %v1811_v24, %v1807_v34 }
  0xa7   :  { %1277 = vmatpush3.bf16.msra.mxu1 %v1692_v58  ;;  %190 = vmatmul.mubr.f32.vlgmr.msra.gmra.mrb[0].mxu0 %v189_v0  ;;  %v2236_v30 = vpack.c.bf16 %v1833_v16, %v1822_v61 }
  0xa8   :  { %1237 = vmatpush3.bf16.msra.mxu0 %v2218_v20  ;;  %557 = vmatprep.mubr.f32.mxu0 %v180_v18 }
  0xa9   :  { %1279 = vmatprep.subr.bf16.mxu1 %v2219_v15  ;;  %1239 = vmatprep.subr.bf16.mxu0 %v2220_v46 }
  0xab   :  { %1281 = vmatpush3.bf16.msra.mxu1 %v2221_v25 }
  0xac   :  { %1241 = vmatpush3.bf16.msra.mxu0 %v2222_v49  ;;  %1283 = vmatprep.subr.bf16.mxu1 %v2223_v53 }
  0xad   :  { %1243 = vmatprep.subr.bf16.mxu0 %v2224_v14 }
  0xaf   :  { %1285 = vmatpush3.bf16.msra.mxu1 %v2225_v21 }
  0xb0   :  { %1245 = vmatpush3.bf16.msra.mxu0 %v2226_v22  ;;  %1287 = vmatprep.subr.bf16.mxu1 %v1828_v59 }
  0xb1   :  { %1247 = vmatprep.subr.bf16.mxu0 %v2227_v23 }
  0xb3   :  { %1289 = vmatpush3.bf16.msra.mxu1 %v1847_v52 }
  0xb4   :  { %1249 = vmatpush3.bf16.msra.mxu0 %v2228_v28  ;;  %1291 = vmatprep.subr.bf16.mxu1 %v1859_v50 }
  0xb5   :  { %1251 = vmatprep.subr.bf16.mxu0 %v2229_v29 }
  0xb7   :  { %1293 = vmatpush3.bf16.msra.mxu1 %v1862_v3 }
  0xb8   :  { %1253 = vmatpush3.bf16.msra.mxu0 %v2230_v33  ;;  %1295 = vmatprep.subr.bf16.mxu1 %v1866_v32 }
  0xb9   :  { %1255 = vmatprep.subr.bf16.mxu0 %v2231_v2 }
  0xbb   :  { %1297 = vmatpush3.bf16.msra.mxu1 %v1868_v56 }
  0xbc   :  { %1257 = vmatpush3.bf16.msra.mxu0 %v2232_v6  ;;  %1331 = vmatprep.subr.bf16.mxu1 %v1542_v63  ;;  %v2237_v63 = vpack.c.bf16 %v1852_v44, %v1841_v43 }
  0xbd   :  { %1259 = vmatprep.subr.bf16.mxu0 %v2233_v36 }
  0xbe   :  { %668 = vmatmul.mubr.f32.vlgmr.msra.gmra.mrb[2].mxu1 %v187_v17 }
  0xbf   :  { %1333 = vmatpush3.bf16.msra.mxu1 %v1565_v7  ;;  %958 = vmatprep.mubr.msk.f32.mxu1 %vm2005_vm5, %v2234_v39  ;;  %v2238_v7 = vld [vmem:[#allocation9_spill] sm:$0xff] }
  0xc0   :  { %1261 = vmatpush3.bf16.msra.mxu0 %v2235_v38  ;;  %1335 = vmatprep.subr.bf16.mxu1 %v1593_v40  ;;  %v2240_v40 = vld [vmem:[#allocation11_spill] sm:$0xff] }
  0xc1   :  { %1263 = vmatprep.subr.bf16.mxu0 %v2236_v30 }
  0xc3   :  { %1337 = vmatpush3.bf16.msra.mxu1 %v1644_v13  ;;  %v2242_v13 = vld [vmem:[#allocation13_spill] sm:$0xff] }
  0xc4   :  { %1265 = vmatpush3.bf16.msra.mxu0 %v2237_v63  ;;  %1339 = vmatprep.subr.bf16.mxu1 %v1666_v55 }
  0xc5   :  { %1299 = vmatprep.subr.bf16.mxu0 %v1910_v48 }
  0xc7   :  { %560 = vmatmul.mubr.f32.vlgmr.msra.gmra.mrb[2].mxu0 %v186_v51  ;;  %1341 = vmatpush3.bf16.msra.mxu1 %v1692_v58 }
  0xc8   :  { %1301 = vmatpush3.bf16.msra.mxu0 %v1916_v11  ;;  %956 = vmatprep.mubr.msk.f32.mxu0 %vm2005_vm5, %v2234_v39 }
  0xc9   :  { %1343 = vmatprep.subr.bf16.mxu1 %v2219_v15  ;;  %1303 = vmatprep.subr.bf16.mxu0 %v1922_v62 }
  0xcb   :  { %1345 = vmatpush3.bf16.msra.mxu1 %v2221_v25 }
  0xcc   :  { %1305 = vmatpush3.bf16.msra.mxu0 %v1928_v8  ;;  %1347 = vmatprep.subr.bf16.mxu1 %v2223_v53 }
  0xcd   :  { %1307 = vmatprep.subr.bf16.mxu0 %v1935_v41 }
  0xcf   :  { %1349 = vmatpush3.bf16.msra.mxu1 %v2225_v21 }
  0xd0   :  { %1309 = vmatpush3.bf16.msra.mxu0 %v1941_v26  ;;  %1351 = vmatprep.subr.bf16.mxu1 %v1828_v59 }
  0xd1   :  { %1311 = vmatprep.subr.bf16.mxu0 %v2238_v7 }
  0xd3   :  { %1353 = vmatpush3.bf16.msra.mxu1 %v1847_v52 }
  0xd4   :  { %1313 = vmatpush3.bf16.msra.mxu0 %v2239_v12  ;;  %1355 = vmatprep.subr.bf16.mxu1 %v1859_v50 }
  0xd5   :  { %1315 = vmatprep.subr.bf16.mxu0 %v2240_v40 }
  0xd7   :  { %1357 = vmatpush3.bf16.msra.mxu1 %v1862_v3 }
  0xd8   :  { %1317 = vmatpush3.bf16.msra.mxu0 %v2241_v47  ;;  %1359 = vmatprep.subr.bf16.mxu1 %v1866_v32 }
  0xd9   :  { %1319 = vmatprep.subr.bf16.mxu0 %v2242_v13 }
  0xdb   :  { %1361 = vmatpush3.bf16.msra.mxu1 %v1868_v56 }
  0xdc   :  { %1321 = vmatpush3.bf16.msra.mxu0 %v2243_v19 }
  0xdd   :  { %1323 = vmatprep.subr.bf16.mxu0 %v1983_v9 }
  0xde   :  { %959 = vmatmul.mubr.msk.f32.vlgmr.msra.gmra.mrb[4].mxu1 %vm1999_vm2, %v2234_v39 }
  0xe0   :  { %1325 = vmatpush3.bf16.msra.mxu0 %v1989_v31 }
  0xe1   :  { %1327 = vmatprep.subr.bf16.mxu0 %v1995_v5 }
  0xe4   :  { %1329 = vmatpush3.bf16.msra.mxu0 %v2244_v60 }
  0xe7   :  { %957 = vmatmul.mubr.msk.f32.vlgmr.msra.gmra.mrb[4].mxu0 %vm1999_vm2, %v2234_v39 }
 0x171   :  { %v1027_v55 = vpop.f32.mrb[0].mxu1 }
 0x172   :  { %v1028_v35 = vpop.f32.mrb[1].mxu1 }
 0x173   :  { %v1029_v45 = vadd.f32 %v1028_v35, %v1027_v55 }
 0x17a   :  { %v992_v42 = vpop.f32.mrb[0].mxu0 }
 0x17b   :  { %v993_v58 = vpop.f32.mrb[1].mxu0 }
 0x17c   :  { %v994_v10 = vadd.f32 %v993_v58, %v992_v42 }
 0x17e   :  { %v424_v4 = vadd.f32 %v1029_v45, %v994_v10 }
 0x191   :  { %v1097_v44 = vpop.f32.mrb[2].mxu1 }
 0x192   :  { %v1098_v57 = vpop.f32.mrb[3].mxu1 }
 0x193   :  { %v1099_v27 = vadd.f32 %v1098_v57, %v1097_v44 }
 0x19a   :  { %v1062_v1 = vpop.f32.mrb[2].mxu0 }
 0x19b   :  { %v1063_v16 = vpop.f32.mrb[3].mxu0 }
 0x19c   :  { %v1064_v34 = vadd.f32 %v1063_v16, %v1062_v1 }
 0x19e   :  { %v562_v24 = vadd.f32 %v1064_v34, %v424_v4 }
 0x1a0   :  { %v670_v52 = vadd.f32 %v1099_v27, %v562_v24 }
 0x1b1   :  { %v1167_v61 = vpop.f32.mrb[4].mxu1 }
 0x1b2   :  { %v1168_v59 = vpop.f32.mrb[5].mxu1 }
 0x1b3   :  { %v1169_v56 = vadd.f32 %v1168_v59, %v1167_v61 }
 0x1ba   :  { %v1132_v43 = vpop.f32.mrb[4].mxu0 }
 0x1bb   :  { %v1133_v50 = vpop.f32.mrb[5].mxu0 }
 0x1bc   :  { %v1134_v3 = vadd.f32 %v1133_v50, %v1132_v43 }
 0x1be   :  { %v838_v32 = vadd.f32 %v1134_v3, %v670_v52 }
 0x1c0   :  { %v942_v5 = vadd.f32 %v1169_v56, %v838_v32 }
 0x1c2   :  { %945 = vst [vmem:[%s2126_s2] sm:$0xff] %v942_v5 }
 0x1c3   :  { %950 = vsyncpa [#allocation3], 1 }

</bundles_post_ra>
